<compile_context>
chip_gen: v7x
topology: tpu7x:2x2x1
jax: 0.10.0
libtpu: 0.0.40
codegen_flags: <defaults>
</compile_context>

<pallas_src>
import functools

import jax
import jax.numpy as jnp
from jax.experimental import pallas as pl
from jax.experimental.pallas import tpu as pltpu

NUM_CLASSES = 4          # background index == NUM_CLASSES
FOCAL_ALPHA = 0.25
FOCAL_GAMMA = 2          # gamma == 2 -> plain multiplies, no pow transcendental

_LANE = 128
_MAX_TILE_L = 16384             # lane extent per block (multiple of 128)
_MAX_BLOCK_ELEMS = 8 * 16384    # ~512 KiB f32 per block, ~1 MiB double-buffered
_PALLAS_MIN_ELEMS = 1 << 20     # below this, fused jnp beats the kernel dispatch


def _round_up(x, m):
    return ((x + m - 1) // m) * m


# --------------------------------------------------------------------------
# Kernel: background sigmoid-focal term  softplus(x) * sigmoid(x)^2, summed.
# Each grid step handles one lane-dense (R, TILE_L) block and writes its own
# partial sum (grid axis fully parallel; no cross-step state).
# --------------------------------------------------------------------------
def _bg_focal_kernel(x_ref, out_ref, *, tile_l, l_total, needs_mask):
    x = x_ref[...].astype(jnp.float32)                 # (R, TILE_L); f32 math (v5e-safe)

    # One exp + one log + one reciprocal per element (single EUP slot binds).
    e = jnp.exp(-jnp.abs(x))
    softplus = jnp.maximum(x, 0.0) + jnp.log1p(e)      # stable log(1 + exp(x))
    inv = pl.reciprocal(1.0 + e, approx=False)         # EUP, exact (torch parity)
    p = jnp.where(x >= 0.0, inv, e * inv)              # sigmoid(x)

    loss = softplus * p * p                            # background focal / (1 - alpha)

    if needs_mask:
        # Last lane-tile may read past HW: mask with a select so OOB garbage
        # (possibly inf/nan) cannot propagate into the partial sum.
        j = pl.program_id(0)
        col = j * tile_l + jax.lax.broadcasted_iota(jnp.int32, x.shape, 1)
        loss = jnp.where(col < l_total, loss, 0.0)

    out_ref[...] = jnp.sum(loss).reshape(1, 1, 1)


def _background_focal_sum_ref(x):
    x = x.astype(jnp.float32)
    p = jax.nn.sigmoid(x)
    return jnp.sum(jax.nn.softplus(x) * p * p)


def background_focal_sum(pred_logits, use_pallas=None):
    """Sum over all logits of softplus(x) * sigmoid(x)^2 (bg focal term / (1-alpha))."""
    B, C, HW = pred_logits.shape
    total = B * C * HW
    if use_pallas is None:
        use_pallas = total >= _PALLAS_MIN_ELEMS
    if not use_pallas:
        return _background_focal_sum_ref(pred_logits)

    R = B * C
    # Contiguous reshape: (B, C, HW) -> (B*C, HW).  No transpose, no copy.
    # (bf16 inputs are accepted and cast in-kernel; feeding bf16 from upstream
    #  halves HBM/DMA bytes.)
    x2d = pred_logits.reshape(R, HW)

    # Lane tiling: multiples of 128, or the full dim when HW < 128.
    if HW < _LANE:
        tile_l = HW
    else:
        tile_l = min(_MAX_TILE_L, (HW // _LANE) * _LANE)
        cap = max(_LANE, (_MAX_BLOCK_ELEMS // R) // _LANE * _LANE)  # VMEM guard
        tile_l = min(tile_l, cap)
        if pl.cdiv(HW, tile_l) == 1 and HW >= 2 * _LANE:
            # Split into >=2 blocks so v7x's two TensorCores both get work.
            tile_l = _round_up(pl.cdiv(HW, 2), _LANE)
    num_l = pl.cdiv(HW, tile_l)
    needs_mask = (HW % tile_l) != 0

    kernel = functools.partial(_bg_focal_kernel, tile_l=tile_l, l_total=HW,
                               needs_mask=needs_mask)
    partials = pl.pallas_call(
        kernel,
        out_shape=jax.ShapeDtypeStruct((num_l, 1, 1), jnp.float32),
        grid=(num_l,),
        in_specs=[pl.BlockSpec((R, tile_l), lambda j: (0, j))],
        out_specs=pl.BlockSpec((1, 1, 1), lambda j: (j, 0, 0)),
        compiler_params=pltpu.CompilerParams(
            dimension_semantics=("parallel",)),
    )(x2d)
    return jnp.sum(partials)


# --------------------------------------------------------------------------
# smooth-L1 over matched points: tiny (N, K) -> plain JAX, no kernel dispatch
# --------------------------------------------------------------------------
def smooth_l1_mean_sum(src, tgt):
    d = src.astype(jnp.float32) - tgt.astype(jnp.float32)
    ad = jnp.abs(d)
    l = jnp.where(ad < 1.0, 0.5 * d * d, ad - 0.5)      # beta = 1.0 (torch default)
    return jnp.sum(jnp.mean(l, axis=-1))


# --------------------------------------------------------------------------
# SetCriterion.forward (losses = ['labels', 'points'])
# --------------------------------------------------------------------------
def set_criterion_forward(outputs, targets, indices, use_pallas=None):
    # TODO(synk): the Hungarian / min-cost matcher is host-side combinatorial
    # code with no clean Pallas equivalent; `indices` is supplied precomputed.
    num_inst = sum(int(t["labels"].shape[0]) for t in targets)
    num_inst = max(float(num_inst), 1.0)   # world_size == 1, clamp(min=1)

    pred_logits = outputs["pred_logits"]   # (B, C, HW), channels-second
    pred_points = outputs["pred_points"]   # (B, K, HW)
    bs, C, HW = pred_logits.shape

    sizes = [int(src.shape[0]) for src, _ in indices]
    n_total = sum(sizes)

    # ----- loss_labels -----
    # Dense background term over every logit (Pallas kernel), alpha folded here.
    loss_ce = (1.0 - FOCAL_ALPHA) * background_focal_sum(pred_logits,
                                                         use_pallas=use_pallas)
    if n_total > 0:
        batch_idx = jnp.concatenate(
            [jnp.full_like(src, i) for i, (src, _) in enumerate(indices)])
        src_idx = jnp.concatenate([src for src, _ in indices])
        target_classes_o = jnp.concatenate(
            [t["labels"][J] for t, (_, J) in zip(targets, indices)]).astype(jnp.int32)
        # Sparse correction for the <= N matched (b, class, h) logits:
        # add their foreground focal term, subtract the background term the
        # kernel already counted for them.
        x_m = pred_logits[batch_idx, target_classes_o, src_idx].astype(jnp.float32)
        p_m = jax.nn.sigmoid(x_m)
        fg = FOCAL_ALPHA * (1.0 - p_m) ** 2 * jax.nn.softplus(-x_m)
        bg = (1.0 - FOCAL_ALPHA) * (p_m ** 2) * jax.nn.softplus(x_m)
        loss_ce = loss_ce + jnp.sum(fg - bg)
    loss_ce = loss_ce / num_inst

    # ----- loss_points -----
    if n_total > 0:
        # Gather N matched columns directly from (B, K, HW): no full transpose.
        src_points_m = pred_points[batch_idx, :, src_idx]            # (N, K)
        target_points = jnp.concatenate(
            [t["points"][i] for t, (_, i) in zip(targets, indices)], axis=0)
        loss_points = smooth_l1_mean_sum(src_points_m, target_points) / num_inst
    else:
        loss_points = jnp.float32(0.0)

    return {"loss_ce_sparse": loss_ce, "loss_point_sparse": loss_points}


# --------------------------------------------------------------------------
# Plain-JAX mirror of the torch reference (for the demo correctness check)
# --------------------------------------------------------------------------
def _loss_ce_reference(pred_logits, targets, indices, num_inst):
    bs, C, HW = pred_logits.shape
    src = jnp.transpose(pred_logits, (0, 2, 1)).reshape(bs * HW, C).astype(jnp.float32)
    labels = jnp.zeros((bs * HW, C), jnp.float32)
    for i, (s, j) in enumerate(indices):
        cls = jnp.asarray(targets[i]["labels"])[j]
        rows = i * HW + s
        labels = labels.at[rows, cls].set(1.0)
    p = jax.nn.sigmoid(src)
    ce = jnp.where(labels > 0, jax.nn.softplus(-src), jax.nn.softplus(src))
    p_t = p * labels + (1.0 - p) * (1.0 - labels)
    loss = ce * (1.0 - p_t) ** 2
    alpha_t = FOCAL_ALPHA * labels + (1.0 - FOCAL_ALPHA) * (1.0 - labels)
    return jnp.sum(alpha_t * loss) / num_inst


if __name__ == "__main__":
    key = jax.random.PRNGKey(0)
    bs, C, H, W, K = 2, NUM_CLASSES, 16, 16, 8
    HW = H * W
    k1, k2, k3 = jax.random.split(key, 3)

    pred_logits = jax.random.normal(k1, (bs, C, HW), dtype=jnp.float32)
    pred_points = jax.random.normal(k2, (bs, K, HW), dtype=jnp.float32)
    outputs = {"pred_logits": pred_logits, "pred_points": pred_points}

    # Deterministic synthetic targets + precomputed matching indices (3 GT/image).
    n_gt = 3
    targets, indices = [], []
    for b in range(bs):
        kb1, kb2 = jax.random.split(jax.random.fold_in(k3, b))
        labels = jax.random.randint(kb1, (n_gt,), 0, NUM_CLASSES, dtype=jnp.int32)
        points = jax.random.normal(kb2, (n_gt, K), dtype=jnp.float32)
        targets.append({"labels": labels, "points": points})
        src = jnp.array([5 + 10 * b, 40 + b, 200 - 7 * b], dtype=jnp.int32)
        tgt = jnp.array([2, 0, 1], dtype=jnp.int32)
        indices.append((src, tgt))

    # Force the Pallas path at demo size so the kernel is actually exercised.
    losses = set_criterion_forward(outputs, targets, indices, use_pallas=True)
    losses = jax.block_until_ready(losses)

    # Correctness check against the plain-JAX mirror of the torch reference.
    num_inst = max(float(sum(int(t["labels"].shape[0]) for t in targets)), 1.0)
    ref_ce = float(_loss_ce_reference(pred_logits, targets, indices, num_inst))
    got_ce = float(losses["loss_ce_sparse"])
    assert abs(got_ce - ref_ce) <= 2e-3 * abs(ref_ce) + 1e-5, (got_ce, ref_ce)

    print("KERNEL_OK")
</pallas_src>

<mosaic_0001>
module attributes {stable_mosaic.version = 11 : i64} {
  func.func @_bg_focal_kernel(%arg0: i32, %arg1: memref<8x128xf32, #tpu.memory_space<vmem>>, %arg2: memref<1x1x1xf32, #tpu.memory_space<vmem>>) attributes {dimension_semantics = [#tpu.dimension_semantics<parallel>], iteration_bounds = array<i64: 2>, scalar_prefetch = 0 : i64, scratch_operands = 0 : i64, tpu.core_type = #tpu.core_type<tc>, window_params = [{transform_indices = @transform_0, window_bounds = array<i64: 8, 128>}, {transform_indices = @transform_1, window_bounds = array<i64: 1, 1, 1>}]} {
    %c0 = arith.constant 0 : index
    %c0_0 = arith.constant 0 : index
    %0 = vector.load %arg1[%c0, %c0_0] : memref<8x128xf32, #tpu.memory_space<vmem>>, vector<8x128xf32>
    %1 = math.absf %0 : vector<8x128xf32>
    %cst = arith.constant 0.000000e+00 : f32
    %2 = vector.broadcast %cst : f32 to vector<8x128xf32>
    %3 = arith.subf %2, %1 : vector<8x128xf32>
    %4 = math.exp %3 : vector<8x128xf32>
    %cst_1 = arith.constant 0.000000e+00 : f32
    %5 = vector.broadcast %cst_1 : f32 to vector<8x128xf32>
    %6 = arith.maximumf %0, %5 : vector<8x128xf32>
    %7 = math.log1p %4 : vector<8x128xf32>
    %8 = arith.addf %6, %7 : vector<8x128xf32>
    %cst_2 = arith.constant 1.000000e+00 : f32
    %9 = vector.broadcast %cst_2 : f32 to vector<8x128xf32>
    %10 = arith.addf %9, %4 : vector<8x128xf32>
    %11 = tpu.reciprocal %10 : vector<8x128xf32> -> vector<8x128xf32>
    %cst_3 = arith.constant 0.000000e+00 : f32
    %12 = vector.broadcast %cst_3 : f32 to vector<8x128xf32>
    %13 = arith.cmpf oge, %0, %12 : vector<8x128xf32>
    %14 = arith.mulf %4, %11 : vector<8x128xf32>
    %15 = arith.select %13, %11, %14 : vector<8x128xi1>, vector<8x128xf32>
    %16 = arith.mulf %8, %15 : vector<8x128xf32>
    %17 = arith.mulf %16, %15 : vector<8x128xf32>
    %18 = vector.shape_cast %17 : vector<8x128xf32> to vector<1x8x128xf32>
    %cst_4 = arith.constant dense<0.000000e+00> : vector<1xf32>
    %19 = vector.multi_reduction <add>, %18, %cst_4 [1, 2] : vector<1x8x128xf32> to vector<1xf32>
    %20 = vector.shape_cast %19 : vector<1xf32> to vector<1x1x1xf32>
    %21 = vector.extract %20[0, 0, 0] : f32 from vector<1x1x1xf32>
    %22 = vector.broadcast %21 : f32 to vector<1x1x1xf32>
    %c0_5 = arith.constant 0 : index
    %c0_6 = arith.constant 0 : index
    %c0_7 = arith.constant 0 : index
    %23 = vector.load %arg2[%c0_5, %c0_6, %c0_7] : memref<1x1x1xf32, #tpu.memory_space<vmem>>, vector<1x1x1xf32>
    tpu.vector_store %arg2[%c0_5, %c0_6, %c0_7], %22 {strides = array<i32>} : memref<1x1x1xf32, #tpu.memory_space<vmem>>, vector<1x1x1xf32>,
    return
  }
  func.func @transform_0(%arg0: i32) -> (i32, i32) {
    %c0_i32 = arith.constant 0 : i32
    %c0_i32_0 = arith.constant 0 : i32
    return %c0_i32, %arg0 : i32, i32
  }
  func.func @transform_1(%arg0: i32) -> (i32, i32, i32) {
    %c0_i32 = arith.constant 0 : i32
    %c0_i32_0 = arith.constant 0 : i32
    %c0_i32_1 = arith.constant 0 : i32
    return %arg0, %c0_i32, %c0_i32_0 : i32, i32, i32
  }
}

</mosaic_0001>

<bundles_post_ra>
// kernel: tpu_custom_call.1
= control target key start
LH: loop header
LB: loop body
LE: loop exit
PB: predicated region body
PF: predicated region fallthrough
CT: control target
= control target key end

     0   :  { %6 = vsyncpa [#allocation3], 0  ;;  %s464_s0 = inlined_call_operand.hbm [shape: f32[8,256], index: 0, kind: input, shape index: {}]   ;;  %s465_s1 = inlined_call_operand.vmem [shape: f32[2,1,1], index: 1, kind: output, shape index: {}]  }
   0x1   :  { %8 = vsyncpa [#allocation3 + $0x1], 0  ;;  %s357_s6 = smov 0   ;;  %s359_s7 = smov 0  }
   0x2   :  { %s361_s8 = smov 0   ;;  %s363_s9 = smov 0  }
   0x3 LB: > { %s376_s10 = sadd.s32 4294967295, %s344_s9   ;;  %s379_s11 = sadd.s32 1, %s344_s9   ;;  %s344_s9 = sphi %s363_s9, %s473_s9   ;;  %s340_s8 = sphi %s361_s8, %s472_s8   ;;  %s336_s7 = sphi %s359_s7, %s471_s7   ;;  %s332_s6 = sphi %s357_s6, %s470_s6  }
   0x4   : > { %s18_s12 = ssub.s32 %s344_s9, %s379_s11  ;;  %s21_s13 = sadd.s32 1, %s340_s8 }
   0x5   : > { %p19_p0 = scmp.eq.s32.totalorder %s18_s12, 0  ;;  %p28_p1 = scmp.ne.s32.totalorder %s340_s8, %s336_s7 }
   0x6   : > { %p29_p2 = scmp.eq.s32.totalorder %s344_s9, 0  ;;  %p34_p3 = scmp.ne.s32.totalorder %s336_s7, %s332_s6 }
   0x7   : > { %s389_s14 = scalar_select %p19_p0, %s340_s8, %s21_s13  }
   0x8   : > { %p30_p4 = por %p29_p2, %p28_p1  ;;  %p35_p5 = scmp.eq.s32.totalorder %s376_s10, 0 }
   0x9   : > { %p241_p6 = scmp.lt.s32.totalorder %s344_s9, 2  ;;  %s84_s16 = sand.u32 1, %s340_s8  }
   0xa   : > { %p393_p7 = por %p35_p5, %p34_p3  ;;  %s227_s17 = sshll.u32 %s84_s16, 3 }
   0xb   : > { %s228_s18 = sshll.u32 %s344_s9, 7  ;;  %s88_s22 = scalar_lea.vmem [#allocation2], %s227_s17 }
   0xc   : > { %s402_s21 = scalar_lea.hbm %s464_s0, %s228_s18  ;;  %s95_s23 = sshll.u32 %s88_s22, 4  ;;  %s404_s23 = int_to_ptr.vmem [resolvable:$true] %s95_s23 }
   0xd   : > { %p406_p8 = pnand %p241_p6, %p30_p4  ;;  %s85_s25 = scalar_lea.sflag [#allocation3], %s84_s16 }
   0xe   : > { %s280_s26 = scalar_lea.hbm %s402_s21, 128  ;;  %s285_s29 = scalar_lea.hbm %s464_s0, 256 }
   0xf   : > { %p281_p11 = scmp.ne.s32.totalorder %s402_s21, %s280_s26  ;;  %p282_p12 = pneg %p406_p8 }
  0x10   : > { %p286_p1 = scmp.lt.u32.totalorder %s402_s21, %s464_s0  ;;  %p287_p2 = scmp.lt.u32.totalorder %s285_s29, %s280_s26 }
  0x11   : > { %p283_p13 = pnand %p282_p12, %p281_p11  ;;  %p289_p4 = scmp.lt.u32.totalorder %s280_s26, %s402_s21 }
  0x12   : > { %p288_p3 = por %p287_p2, %p286_p1 }
  0x13   : > { %p284_p0 = pneg %p283_p13 }
  0x14   : > { %p290_p5 = por %p289_p4, %p288_p3 }
  0x16   : > { %p291_p6 = pnand %p290_p5, %p284_p0 }
  0x18   : > { %294 = shalt.err (!%p291_p6)
}
  0x19   : > { %s295_s3 = scalar_lea.vmem %s404_s23, 128  ;;  %s346_s4 = smov [#allocation2]  }
  0x1a   : > { %p296_p11 = scmp.ne.s32.totalorder %s404_s23, %s295_s3  ;;  %s300_s5 = sshll.u32 %s346_s4, 4  ;;  %s301_s5 = int_to_ptr.vmem [resolvable:$false] %s300_s5 }
  0x1b   : > { %s302_s6 = scalar_lea.vmem %s301_s5, 256  ;;  %p303_p10 = scmp.lt.s32.totalorder %s404_s23, %s301_s5 }
  0x1c   : > { %p298_p13 = pnand %p296_p11, %p282_p12  ;;  %p304_p1 = scmp.lt.s32.totalorder %s302_s6, %s295_s3 }
  0x1e   : > { %p299_p9 = pneg %p298_p13  ;;  %p305_p2 = por %p304_p1, %p303_p10 }
  0x20   : > { %p306_p3 = pnand %p305_p2, %p299_p9 }
  0x22   : > { %309 = shalt.err (!%p306_p3)
}
  0x23   : > { %240 = dma.hbm_to_vmem [thread:$0]  (!%p406_p8), %s402_s21, 128, %s404_s23, %s85_s25  }
  0x24   : > { %p468_p0 = scmp.lt.s32.totalorder %s344_s9, 3  ;;  %p469_p4 = scmp.ge.s32.totalorder %s344_s9, 1 }
  0x26   : > { %p101_p12 = pnand %p469_p4, %p468_p0 }
  0x27   : > { %s106_s12 = sand.u32 (!%p101_p12), 1, %s336_s7  }
  0x28   : > { %104 = sbr.rel (%p101_p12) target bundleno = 294 (0x126), region = 24  ;;  %s230_s13 = sshll.u32 (!%p101_p12), %s106_s12, 3 }
  0x29   : > { %s107_s16 = scalar_lea.sflag (!%p101_p12), [#allocation3], %s106_s12  ;;  %s110_s17 = scalar_lea.vmem (!%p101_p12), [#allocation2], %s230_s13 }
  0x2f   : > { %327 = dma.done.wait (%p393_p7), %s107_s16, 128  }
  0x30   : > { %329 = vsyncadd (%p393_p7), %s107_s16, 4294967168  ;;  %v130_v0 = vld [vmem:[%s110_s17] sm:$0xff]  ;;  %p127_p7 = scmp.lt.s32.totalorder %s376_s10, 1  ;;  %vm163_vm2 = vcmask 0  }
  0x31   : > { %v131_v1 = vand.u32 2147483647, %v130_v0  ;;  %v135_v11 = vmax.f32 %v130_v0, 0.0  ;;  %vm148_vm1 = vcmp.ge.f32.partialorder %v130_v0, 0.0 }
  0x32   : > { %s475_s10 = smov (!%p127_p7, %s376_s10), 1 }
  0x33   : > { %v132_v2 = vsub.f32 0.0, %v131_v1  ;;  %s129_s18 = scalar_lea.vmem %s465_s1, %s475_s10 }
  0x35   : > { %v133_v3 = vmul.f32 1.442695, %v132_v2 }
  0x37   : > { %274 = vpow2.f32 %v133_v3 }
  0x41   : > { %v275_v4 = vpop.eup %274 }
  0x42   : > { %v136_v5 = vadd.f32 1.0, %v275_v4  ;;  %v139_v6 = vmul.f32 -0.5, %v275_v4  ;;  %v142_v8 = vand.u32 2147483647, %v275_v4 }
  0x44   : > { %276 = vlog2.f32 %v136_v5  ;;  %v140_v7 = vadd.f32 1.0, %v139_v6  ;;  %vm143_vm0 = vcmp.lt.f32.partialorder %v142_v8, 0.0004427343 }
  0x45   : > { %278 = vrcp.f32 %v136_v5 }
  0x46   : > { %v141_v9 = vmul.f32 %v275_v4, %v140_v7 }
  0x4e   : > { %v277_v10 = vpop.eup %276 }
  0x4f   : > { %v279_v12 = vpop.eup %278  ;;  %v138_v13 = vmul.f32 0.6931472, %v277_v10 }
  0x50   : > { %v149_v14 = vmul.f32 %v279_v12, %v275_v4 }
  0x51   : > { %v144_v15 = vsel %vm143_vm0, %v141_v9, %v138_v13 }
  0x52   : > { %v145_v16 = vadd.f32 %v144_v15, %v135_v11  ;;  %v150_v17 = vsel %vm148_vm1, %v279_v12, %v149_v14 }
  0x54   : > { %v151_v18 = vmul.f32 %v150_v17, %v145_v16 }
  0x56   : > { %v152_v19 = vmul.f32 %v151_v18, %v150_v17 }
  0x58   : > { %153 = vadd.xlane.f32.xlu0 %v152_v19 }
  0xe5   : > { %v154_v20 = vpop.xlane.xlu0 %153 }
  0xe6   : > { %v155_v21 = vrot.slane %v154_v20, 4 }
  0xe8   : > { %v156_v22 = vadd.f32 %v155_v21, %v154_v20 }
  0xea   : > { %v157_v23 = vrot.slane %v156_v22, 2 }
  0xec   : > { %v158_v24 = vadd.f32 %v157_v23, %v156_v22 }
  0xee   : > { %v159_v25 = vrot.slane %v158_v24, 1 }
  0xf0   : > { %v160_v26 = vadd.f32 %v159_v25, %v158_v24 }
  0xf2   : > { %233 = vpush %v160_v26 }
 0x123   : > { %s234_s19 = spop %233 }
 0x124   : > { %v162_v27 = vstv %s234_s19 }
 0x125   : > { %164 = vst.msk [vmem:[%s129_s18] sm:$0x1] %vm163_vm2, %v162_v27 }
 0x126 PF: > { %p11_p8 = scmp.ge.s32.totalorder %s379_s11, 4   ;;  %s470_s6 = smov %s336_s7 }
 0x127   : > { %s471_s7 = smov %s340_s8  ;;  %s472_s8 = smov %s389_s14 }
 0x128   : > { %s473_s9 = smov %s379_s11  ;;  %13 = sbr.rel (!%p11_p8) target bundleno = 3 (0x3), region = 64 }
 0x12f   :  { %182 = vsyncpa [#allocation3], 1 }
 0x130   :  { %184 = vsyncpa [#allocation3 + $0x1], 1 }

</bundles_post_ra>
